<compile_context>
chip_gen: v5e
topology: v5e:2x2
jax: 0.10.0
libtpu: 0.0.40
codegen_flags: <defaults>
</compile_context>

<pallas_src>
import functools
import math

import jax
import jax.numpy as jnp
from jax import lax
from jax.experimental import pallas as pl
from jax.experimental.pallas import tpu as pltpu


BN_EPS = 1e-5
_LANE = 128
_SUBLANE = 8
_SMALL_C_MAX = 32       # pixels-on-lanes VPU path below this, MXU path above
_CORE_SPLIT = 2         # v7x has 2 TCs; a size-2 parallel axis is harmless on v5e/v6e


def _round_up(x, m):
    return (x + m - 1) // m * m


def _vmem_limit_bytes():
    """Generation-aware VMEM budget: ~3/4 of physical, capped at 110 MiB.
    -> ~48 MiB on v7x (64 MiB physical), ~96 MiB on v5e/v6e (128 MiB physical)."""
    try:
        cap = int(pltpu.get_tpu_info().vmem_capacity_bytes)
        if cap <= 0:
            cap = 64 * 1024 * 1024
    except Exception:
        cap = 64 * 1024 * 1024
    return min((cap * 3) // 4, 110 * 1024 * 1024)


# ----------------------------- small-C kernels ------------------------------


def _stats_kernel_small_c(x_ref, w_ref, sum_ref, ssq_ref, *, c, fold):
    """Phase 1 (small C): ReLU -> CxC channel mix (VPU FMAs) -> partial stats.

    x_ref:   (1, C, TR, 128) VMEM   pixels-on-lanes input tile (zero padded)
    w_ref:   (C, C)          SMEM   conv weight [cout, cin]
    sum_ref: (1, C, fold, 128) VMEM per-batch-index accumulator
    ssq_ref: (1, C, fold, 128) VMEM per-batch-index accumulator
    """
    @pl.when(pl.program_id(1) == 0)
    def _():
        sum_ref[...] = jnp.zeros_like(sum_ref)
        ssq_ref[...] = jnp.zeros_like(ssq_ref)

    xr = [jnp.maximum(x_ref[0, ci, :, :], 0.0) for ci in range(c)]   # (TR, 128) each
    tr = xr[0].shape[0]
    for co in range(c):
        y = w_ref[co, 0] * xr[0]
        for ci in range(1, c):
            y = y + w_ref[co, ci] * xr[ci]
        # Fold TR rows onto `fold` sublanes with plain VPU adds; the final
        # collapse to a single per-channel scalar happens once in the wrapper.
        y3 = y.reshape(tr // fold, fold, _LANE)
        sum_ref[0, co, :, :] = sum_ref[0, co, :, :] + jnp.sum(y3, axis=0)
        ssq_ref[0, co, :, :] = ssq_ref[0, co, :, :] + jnp.sum(y3 * y3, axis=0)


def _apply_kernel_small_c(x_ref, w_ref, scale_ref, shift_ref, o_ref, *, c):
    """Phase 2 (small C): recompute ReLU + channel mix, apply folded BN, write out."""
    xr = [jnp.maximum(x_ref[0, ci, :, :], 0.0) for ci in range(c)]
    for co in range(c):
        y = w_ref[co, 0] * xr[0]
        for ci in range(1, c):
            y = y + w_ref[co, ci] * xr[ci]
        o_ref[0, co, :, :] = y * scale_ref[co] + shift_ref[co]


# ----------------------------- large-C kernels ------------------------------


def _stats_kernel_large_c(x_ref, w_ref, sum_ref, ssq_ref):
    """Phase 1 (large C): ReLU -> MXU matmul -> partial per-channel stats.
    Stats only; the conv output never touches HBM (recomputed in phase 2)."""
    @pl.when(pl.program_id(1) == 0)
    def _():
        sum_ref[...] = jnp.zeros_like(sum_ref)
        ssq_ref[...] = jnp.zeros_like(ssq_ref)

    x = jnp.maximum(x_ref[...], 0.0)
    # TODO(synk): for C >~ 256 on v5e (>~ 512 on v6e/v7x) cast x/w to bf16 here
    # (keep f32 accumulation) once output tolerance is re-validated.
    y = jnp.dot(x, w_ref[...], preferred_element_type=jnp.float32)
    tm, cp = y.shape
    y3 = y.reshape(tm // _SUBLANE, _SUBLANE, cp)
    sum_ref[0, :, :] = sum_ref[0, :, :] + jnp.sum(y3, axis=0)
    ssq_ref[0, :, :] = ssq_ref[0, :, :] + jnp.sum(y3 * y3, axis=0)


def _apply_kernel_large_c(x_ref, w_ref, scale_ref, shift_ref, o_ref):
    x = jnp.maximum(x_ref[...], 0.0)
    y = jnp.dot(x, w_ref[...], preferred_element_type=jnp.float32)
    o_ref[...] = (y * scale_ref[...] + shift_ref[...]).astype(o_ref.dtype)


# ------------------------------- drivers ------------------------------------


def _forward_small_c(x_s, w2, gamma, beta, vmem_limit):
    n, c, ho, wo = x_s.shape
    p = ho * wo
    m = n * p                                   # true pixel count for BN stats

    # pixels-on-lanes layout: (N, C, P) -> (N, C, P_rows, 128). No transposes,
    # no channel padding.
    p_rows = _round_up(p, _LANE) // _LANE

    # Row tiles: multi-MiB where possible (phase 2 double-buffers an input and
    # an output tile), bounded by the generation-aware VMEM budget.
    row_bytes = c * _LANE * 4
    tile_rows_target = max(_SUBLANE, min(4096, (vmem_limit // 12) // row_bytes))
    if p_rows <= tile_rows_target:
        tile_rows, n_row_tiles = p_rows, 1
    else:
        tile_rows = max(_SUBLANE, (tile_rows_target // _SUBLANE) * _SUBLANE)
        n_row_tiles = pl.cdiv(p_rows, tile_rows)
    p_rows_pad = n_row_tiles * tile_rows
    fold = math.gcd(tile_rows, _SUBLANE)

    x_flat = x_s.reshape(n, c, p)
    x4 = jnp.pad(x_flat, ((0, 0), (0, 0), (0, p_rows_pad * _LANE - p)))
    x4 = x4.reshape(n, c, p_rows_pad, _LANE)

    # ---- Phase 1: stats only. Batch axis "parallel" (per-n accumulator
    # blocks -> both v7x TensorCores active), row axis "arbitrary" (carry). ----
    psum, pssq = pl.pallas_call(
        functools.partial(_stats_kernel_small_c, c=c, fold=fold),
        grid=(n, n_row_tiles),
        in_specs=[
            pl.BlockSpec((1, c, tile_rows, _LANE), lambda nb, rb: (nb, 0, rb, 0)),
            pl.BlockSpec(memory_space=pltpu.MemorySpace.SMEM),
        ],
        out_specs=[
            pl.BlockSpec((1, c, fold, _LANE), lambda nb, rb: (nb, 0, 0, 0)),
            pl.BlockSpec((1, c, fold, _LANE), lambda nb, rb: (nb, 0, 0, 0)),
        ],
        out_shape=[
            jax.ShapeDtypeStruct((n, c, fold, _LANE), jnp.float32),
            jax.ShapeDtypeStruct((n, c, fold, _LANE), jnp.float32),
        ],
        compiler_params=pltpu.CompilerParams(
            dimension_semantics=("parallel", "arbitrary"),
            vmem_limit_bytes=vmem_limit,
        ),
    )(x4, w2)

    # ---- Fold train-mode BatchNorm into per-channel scale/shift (tiny) ----
    s1 = jnp.sum(psum, axis=(0, 2, 3))
    s2 = jnp.sum(pssq, axis=(0, 2, 3))
    mean = s1 / m
    # TODO(synk): E[y^2]-mean^2 cancels when |mean| >> std; switch to a centered
    # second pass / Welford merge before using with strongly shifted activations.
    var = jnp.maximum(s2 / m - mean * mean, 0.0)
    scale = gamma * lax.rsqrt(var + BN_EPS)
    shift = beta - mean * scale

    # ---- Phase 2: re-read x, recompute ReLU + conv, apply BN, single write ----
    out4 = pl.pallas_call(
        functools.partial(_apply_kernel_small_c, c=c),
        grid=(n, n_row_tiles),
        in_specs=[
            pl.BlockSpec((1, c, tile_rows, _LANE), lambda nb, rb: (nb, 0, rb, 0)),
            pl.BlockSpec(memory_space=pltpu.MemorySpace.SMEM),
            pl.BlockSpec(memory_space=pltpu.MemorySpace.SMEM),
            pl.BlockSpec(memory_space=pltpu.MemorySpace.SMEM),
        ],
        out_specs=pl.BlockSpec((1, c, tile_rows, _LANE), lambda nb, rb: (nb, 0, rb, 0)),
        out_shape=jax.ShapeDtypeStruct((n, c, p_rows_pad, _LANE), jnp.float32),
        compiler_params=pltpu.CompilerParams(
            dimension_semantics=("parallel", "parallel"),
            vmem_limit_bytes=vmem_limit,
        ),
    )(x4, w2, scale, shift)

    out = out4.reshape(n, c, p_rows_pad * _LANE)[:, :, :p]
    return out.reshape(n, c, ho, wo)


def _forward_large_c(x_s, w2, gamma, beta, vmem_limit):
    n, c, ho, wo = x_s.shape
    m = n * ho * wo
    cp = _round_up(c, _LANE)

    # TODO(synk): keep activations NHWC across the surrounding model so this
    # NCHW->NHWC transpose (an extra HBM pass around a memory-bound op) vanishes.
    x_rows = jnp.transpose(x_s, (0, 2, 3, 1)).reshape(m, c)
    w_mat = jnp.transpose(w2, (1, 0))                       # (Cin, Cout)
    w_p = jnp.pad(w_mat, ((0, cp - c), (0, cp - c)))

    # Row tile: as large as fits (x tile + out tile, double-buffered, + weight).
    weight_bytes = 2 * cp * cp * 4
    avail = max(vmem_limit - weight_bytes - (4 << 20), 4 << 20)
    tile_m = min(8192, avail // (4 * cp * 4), _round_up(m, _SUBLANE))
    tile_m = max(_SUBLANE, (int(tile_m) // _SUBLANE) * _SUBLANE)

    m_pad = _round_up(m, tile_m * _CORE_SPLIT)
    tiles_per_split = m_pad // (tile_m * _CORE_SPLIT)
    num_tiles = m_pad // tile_m

    # Zero padding keeps statistics exact (padded rows/channels contribute 0;
    # we divide by the true M below).
    x_p = jnp.pad(x_rows, ((0, m_pad - m), (0, cp - c)))

    # ---- Phase 1: stats only, core-split "parallel" axis for v7x's 2 TCs ----
    psum, pssq = pl.pallas_call(
        _stats_kernel_large_c,
        grid=(_CORE_SPLIT, tiles_per_split),
        in_specs=[
            pl.BlockSpec((tile_m, cp), lambda s, i: (s * tiles_per_split + i, 0)),
            pl.BlockSpec((cp, cp), lambda s, i: (0, 0)),
        ],
        out_specs=[
            pl.BlockSpec((1, _SUBLANE, cp), lambda s, i: (s, 0, 0)),
            pl.BlockSpec((1, _SUBLANE, cp), lambda s, i: (s, 0, 0)),
        ],
        out_shape=[
            jax.ShapeDtypeStruct((_CORE_SPLIT, _SUBLANE, cp), jnp.float32),
            jax.ShapeDtypeStruct((_CORE_SPLIT, _SUBLANE, cp), jnp.float32),
        ],
        compiler_params=pltpu.CompilerParams(
            dimension_semantics=("parallel", "arbitrary"),
            vmem_limit_bytes=vmem_limit,
        ),
    )(x_p, w_p)

    s1 = jnp.sum(psum, axis=(0, 1))
    s2 = jnp.sum(pssq, axis=(0, 1))
    mean = s1 / m
    var = jnp.maximum(s2 / m - mean * mean, 0.0)
    gamma_p = jnp.pad(gamma, (0, cp - c), constant_values=1.0)
    beta_p = jnp.pad(beta, (0, cp - c))
    scale_v = gamma_p * lax.rsqrt(var + BN_EPS)
    shift_v = beta_p - mean * scale_v
    scale = scale_v.reshape(1, cp)
    shift = shift_v.reshape(1, cp)

    # ---- Phase 2: re-read x, recompute ReLU + matmul, apply BN, single write ----
    out_rows = pl.pallas_call(
        _apply_kernel_large_c,
        grid=(num_tiles,),
        in_specs=[
            pl.BlockSpec((tile_m, cp), lambda i: (i, 0)),
            pl.BlockSpec((cp, cp), lambda i: (0, 0)),
            pl.BlockSpec((1, cp), lambda i: (0, 0)),
            pl.BlockSpec((1, cp), lambda i: (0, 0)),
        ],
        out_specs=pl.BlockSpec((tile_m, cp), lambda i: (i, 0)),
        out_shape=jax.ShapeDtypeStruct((m_pad, cp), jnp.float32),
        compiler_params=pltpu.CompilerParams(
            dimension_semantics=("parallel",),
            vmem_limit_bytes=vmem_limit,
        ),
    )(x_p, w_p, scale, shift)

    out_rows = out_rows[:m, :c]
    return jnp.transpose(out_rows.reshape(n, ho, wo, c), (0, 3, 1, 2))


@functools.partial(jax.jit, static_argnames=("stride",))
def preprocess_x(x_nchw, conv_w, bn_gamma, bn_beta, *, stride):
    """Forward pass of PreprocessX.

    x_nchw : (N, C, H, W) float32
    conv_w : (C, C, 1, 1) float32  (PyTorch Conv2d weight, bias=False)
    bn_gamma, bn_beta : (C,) float32
    returns (N, C, Ho, Wo) float32, Ho = floor((H-1)/stride)+1
    """
    # 1x1 conv with stride and no padding == spatial subsampling (indexing glue).
    # TODO(synk): fold this strided slice into the kernel DMA (strided
    # make_async_copy from an ANY-space ref) to drop one wrapper HBM pass.
    x_s = x_nchw[:, :, ::stride, ::stride]
    w2 = conv_w[:, :, 0, 0]                                  # (Cout, Cin)
    c = x_nchw.shape[1]
    vmem_limit = _vmem_limit_bytes()
    if c <= _SMALL_C_MAX:
        return _forward_small_c(x_s, w2, bn_gamma, bn_beta, vmem_limit)
    return _forward_large_c(x_s, w2, bn_gamma, bn_beta, vmem_limit)


def _reference(x_nchw, conv_w, bn_gamma, bn_beta, stride):
    """Pure-JAX reference mirroring PyTorch semantics (train-mode BN)."""
    x = jnp.maximum(x_nchw, 0.0)
    x = x[:, :, ::stride, ::stride]
    w = conv_w[:, :, 0, 0]                                   # (Cout, Cin)
    y = jnp.einsum("oc,nchw->nohw", w, x)
    mean = jnp.mean(y, axis=(0, 2, 3), keepdims=True)
    var = jnp.mean((y - mean) ** 2, axis=(0, 2, 3), keepdims=True)
    y_hat = (y - mean) * lax.rsqrt(var + BN_EPS)
    return y_hat * bn_gamma.reshape(1, -1, 1, 1) + bn_beta.reshape(1, -1, 1, 1)


if __name__ == "__main__":
    key = jax.random.PRNGKey(0)
    k_x, k_w, k_g, k_b = jax.random.split(key, 4)

    N, C, H, W = 2, 4, 16, 16
    STRIDE = 2

    x = jax.random.normal(k_x, (N, C, H, W), dtype=jnp.float32)
    conv_w = jax.random.normal(k_w, (C, C, 1, 1), dtype=jnp.float32) * 0.5
    bn_gamma = 1.0 + 0.1 * jax.random.normal(k_g, (C,), dtype=jnp.float32)
    bn_beta = 0.1 * jax.random.normal(k_b, (C,), dtype=jnp.float32)

    out = preprocess_x(x, conv_w, bn_gamma, bn_beta, stride=STRIDE)
    out = jax.block_until_ready(out)

    ref = _reference(x, conv_w, bn_gamma, bn_beta, STRIDE)
    assert out.shape == (N, C, H // STRIDE, W // STRIDE), out.shape
    assert jnp.allclose(out, ref, atol=5e-5, rtol=5e-5), (
        float(jnp.max(jnp.abs(out - ref)))
    )

    print("KERNEL_OK")
</pallas_src>

<mosaic_0001>
module attributes {stable_mosaic.version = 11 : i64} {
  func.func @_stats_kernel_small_c(%arg0: i32, %arg1: i32, %arg2: memref<1x4x1x128xf32, #tpu.memory_space<vmem>>, %arg3: memref<4x4xf32, #tpu.memory_space<smem>>, %arg4: memref<1x4x1x128xf32, #tpu.memory_space<vmem>>, %arg5: memref<1x4x1x128xf32, #tpu.memory_space<vmem>>) attributes {dimension_semantics = [#tpu.dimension_semantics<parallel>, #tpu.dimension_semantics<arbitrary>], iteration_bounds = array<i64: 2, 1>, scalar_prefetch = 0 : i64, scratch_operands = 0 : i64, tpu.core_type = #tpu.core_type<tc>, window_params = [{transform_indices = @transform_0, window_bounds = array<i64: 1, 4, 1, 128>}, {transform_indices = @transform_1, window_bounds = array<i64: 4, 4>}, {transform_indices = @transform_2, window_bounds = array<i64: 1, 4, 1, 128>}, {transform_indices = @transform_3, window_bounds = array<i64: 1, 4, 1, 128>}]} {
    %c0_i32 = arith.constant 0 : i32
    %0 = arith.cmpi eq, %arg1, %c0_i32 : i32
    %1 = arith.extui %0 : i1 to i32
    %c0_i32_0 = arith.constant 0 : i32
    %2 = arith.cmpi ne, %1, %c0_i32_0 : i32
    scf.if %2 {
      %cst_120 = arith.constant 0.000000e+00 : f32
      %143 = vector.broadcast %cst_120 : f32 to vector<1x4x1x128xf32>
      %c0_121 = arith.constant 0 : index
      %c0_122 = arith.constant 0 : index
      %c0_123 = arith.constant 0 : index
      %c0_124 = arith.constant 0 : index
      %144 = vector.load %arg4[%c0_121, %c0_122, %c0_123, %c0_124] : memref<1x4x1x128xf32, #tpu.memory_space<vmem>>, vector<1x4x1x128xf32>
      tpu.vector_store %arg4[%c0_121, %c0_122, %c0_123, %c0_124], %143 {strides = array<i32>} : memref<1x4x1x128xf32, #tpu.memory_space<vmem>>, vector<1x4x1x128xf32>,
      %cst_125 = arith.constant 0.000000e+00 : f32
      %145 = vector.broadcast %cst_125 : f32 to vector<1x4x1x128xf32>
      %c0_126 = arith.constant 0 : index
      %c0_127 = arith.constant 0 : index
      %c0_128 = arith.constant 0 : index
      %c0_129 = arith.constant 0 : index
      %146 = vector.load %arg5[%c0_126, %c0_127, %c0_128, %c0_129] : memref<1x4x1x128xf32, #tpu.memory_space<vmem>>, vector<1x4x1x128xf32>
      tpu.vector_store %arg5[%c0_126, %c0_127, %c0_128, %c0_129], %145 {strides = array<i32>} : memref<1x4x1x128xf32, #tpu.memory_space<vmem>>, vector<1x4x1x128xf32>,
    } else {
    }
    %c0 = arith.constant 0 : index
    %c0_1 = arith.constant 0 : index
    %c0_2 = arith.constant 0 : index
    %c0_3 = arith.constant 0 : index
    %3 = vector.load %arg2[%c0, %c0_1, %c0_2, %c0_3] : memref<1x4x1x128xf32, #tpu.memory_space<vmem>>, vector<1x1x1x128xf32>
    %4 = vector.shape_cast %3 : vector<1x1x1x128xf32> to vector<1x128xf32>
    %cst = arith.constant 0.000000e+00 : f32
    %5 = vector.broadcast %cst : f32 to vector<1x128xf32>
    %6 = arith.maximumf %4, %5 : vector<1x128xf32>
    %c0_4 = arith.constant 0 : index
    %c1 = arith.constant 1 : index
    %c0_5 = arith.constant 0 : index
    %c0_6 = arith.constant 0 : index
    %7 = vector.load %arg2[%c0_4, %c1, %c0_5, %c0_6] : memref<1x4x1x128xf32, #tpu.memory_space<vmem>>, vector<1x1x1x128xf32>
    %8 = vector.shape_cast %7 : vector<1x1x1x128xf32> to vector<1x128xf32>
    %cst_7 = arith.constant 0.000000e+00 : f32
    %9 = vector.broadcast %cst_7 : f32 to vector<1x128xf32>
    %10 = arith.maximumf %8, %9 : vector<1x128xf32>
    %c0_8 = arith.constant 0 : index
    %c2 = arith.constant 2 : index
    %c0_9 = arith.constant 0 : index
    %c0_10 = arith.constant 0 : index
    %11 = vector.load %arg2[%c0_8, %c2, %c0_9, %c0_10] : memref<1x4x1x128xf32, #tpu.memory_space<vmem>>, vector<1x1x1x128xf32>
    %12 = vector.shape_cast %11 : vector<1x1x1x128xf32> to vector<1x128xf32>
    %cst_11 = arith.constant 0.000000e+00 : f32
    %13 = vector.broadcast %cst_11 : f32 to vector<1x128xf32>
    %14 = arith.maximumf %12, %13 : vector<1x128xf32>
    %c0_12 = arith.constant 0 : index
    %c3 = arith.constant 3 : index
    %c0_13 = arith.constant 0 : index
    %c0_14 = arith.constant 0 : index
    %15 = vector.load %arg2[%c0_12, %c3, %c0_13, %c0_14] : memref<1x4x1x128xf32, #tpu.memory_space<vmem>>, vector<1x1x1x128xf32>
    %16 = vector.shape_cast %15 : vector<1x1x1x128xf32> to vector<1x128xf32>
    %cst_15 = arith.constant 0.000000e+00 : f32
    %17 = vector.broadcast %cst_15 : f32 to vector<1x128xf32>
    %18 = arith.maximumf %16, %17 : vector<1x128xf32>
    %c0_16 = arith.constant 0 : index
    %c0_17 = arith.constant 0 : index
    %19 = memref.load %arg3[%c0_16, %c0_17] : memref<4x4xf32, #tpu.memory_space<smem>>
    %20 = vector.broadcast %19 : f32 to vector<1x128xf32>
    %21 = arith.mulf %20, %6 : vector<1x128xf32>
    %c0_18 = arith.constant 0 : index
    %c1_19 = arith.constant 1 : index
    %22 = memref.load %arg3[%c0_18, %c1_19] : memref<4x4xf32, #tpu.memory_space<smem>>
    %23 = vector.broadcast %22 : f32 to vector<1x128xf32>
    %24 = arith.mulf %23, %10 : vector<1x128xf32>
    %25 = arith.addf %21, %24 : vector<1x128xf32>
    %c0_20 = arith.constant 0 : index
    %c2_21 = arith.constant 2 : index
    %26 = memref.load %arg3[%c0_20, %c2_21] : memref<4x4xf32, #tpu.memory_space<smem>>
    %27 = vector.broadcast %26 : f32 to vector<1x128xf32>
    %28 = arith.mulf %27, %14 : vector<1x128xf32>
    %29 = arith.addf %25, %28 : vector<1x128xf32>
    %c0_22 = arith.constant 0 : index
    %c3_23 = arith.constant 3 : index
    %30 = memref.load %arg3[%c0_22, %c3_23] : memref<4x4xf32, #tpu.memory_space<smem>>
    %31 = vector.broadcast %30 : f32 to vector<1x128xf32>
    %32 = arith.mulf %31, %18 : vector<1x128xf32>
    %33 = arith.addf %29, %32 : vector<1x128xf32>
    %34 = vector.shape_cast %33 : vector<1x128xf32> to vector<1x1x128xf32>
    %c0_24 = arith.constant 0 : index
    %c0_25 = arith.constant 0 : index
    %c0_26 = arith.constant 0 : index
    %c0_27 = arith.constant 0 : index
    %35 = vector.load %arg4[%c0_24, %c0_25, %c0_26, %c0_27] : memref<1x4x1x128xf32, #tpu.memory_space<vmem>>, vector<1x1x1x128xf32>
    %36 = vector.shape_cast %35 : vector<1x1x1x128xf32> to vector<1x128xf32>
    %cst_28 = arith.constant dense<0.000000e+00> : vector<1x128xf32>
    %37 = vector.multi_reduction <add>, %34, %cst_28 [0] : vector<1x1x128xf32> to vector<1x128xf32>
    %38 = arith.addf %36, %37 : vector<1x128xf32>
    %c0_29 = arith.constant 0 : index
    %c0_30 = arith.constant 0 : index
    %c0_31 = arith.constant 0 : index
    %c0_32 = arith.constant 0 : index
    %39 = vector.load %arg4[%c0_29, %c0_30, %c0_31, %c0_32] : memref<1x4x1x128xf32, #tpu.memory_space<vmem>>, vector<1x1x1x128xf32>
    %40 = vector.shape_cast %39 : vector<1x1x1x128xf32> to vector<1x128xf32>
    %41 = vector.shape_cast %38 : vector<1x128xf32> to vector<1x1x1x128xf32>
    tpu.vector_store %arg4[%c0_29, %c0_30, %c0_31, %c0_32], %41 {strides = array<i32>} : memref<1x4x1x128xf32, #tpu.memory_space<vmem>>, vector<1x1x1x128xf32>,
    %c0_33 = arith.constant 0 : index
    %c0_34 = arith.constant 0 : index
    %c0_35 = arith.constant 0 : index
    %c0_36 = arith.constant 0 : index
    %42 = vector.load %arg5[%c0_33, %c0_34, %c0_35, %c0_36] : memref<1x4x1x128xf32, #tpu.memory_space<vmem>>, vector<1x1x1x128xf32>
    %43 = vector.shape_cast %42 : vector<1x1x1x128xf32> to vector<1x128xf32>
    %44 = arith.mulf %34, %34 : vector<1x1x128xf32>
    %cst_37 = arith.constant dense<0.000000e+00> : vector<1x128xf32>
    %45 = vector.multi_reduction <add>, %44, %cst_37 [0] : vector<1x1x128xf32> to vector<1x128xf32>
    %46 = arith.addf %43, %45 : vector<1x128xf32>
    %c0_38 = arith.constant 0 : index
    %c0_39 = arith.constant 0 : index
    %c0_40 = arith.constant 0 : index
    %c0_41 = arith.constant 0 : index
    %47 = vector.load %arg5[%c0_38, %c0_39, %c0_40, %c0_41] : memref<1x4x1x128xf32, #tpu.memory_space<vmem>>, vector<1x1x1x128xf32>
    %48 = vector.shape_cast %47 : vector<1x1x1x128xf32> to vector<1x128xf32>
    %49 = vector.shape_cast %46 : vector<1x128xf32> to vector<1x1x1x128xf32>
    tpu.vector_store %arg5[%c0_38, %c0_39, %c0_40, %c0_41], %49 {strides = array<i32>} : memref<1x4x1x128xf32, #tpu.memory_space<vmem>>, vector<1x1x1x128xf32>,
    %c1_42 = arith.constant 1 : index
    %c0_43 = arith.constant 0 : index
    %50 = memref.load %arg3[%c1_42, %c0_43] : memref<4x4xf32, #tpu.memory_space<smem>>
    %51 = vector.broadcast %50 : f32 to vector<1x128xf32>
    %52 = arith.mulf %51, %6 : vector<1x128xf32>
    %c1_44 = arith.constant 1 : index
    %c1_45 = arith.constant 1 : index
    %53 = memref.load %arg3[%c1_44, %c1_45] : memref<4x4xf32, #tpu.memory_space<smem>>
    %54 = vector.broadcast %53 : f32 to vector<1x128xf32>
    %55 = arith.mulf %54, %10 : vector<1x128xf32>
    %56 = arith.addf %52, %55 : vector<1x128xf32>
    %c1_46 = arith.constant 1 : index
    %c2_47 = arith.constant 2 : index
    %57 = memref.load %arg3[%c1_46, %c2_47] : memref<4x4xf32, #tpu.memory_space<smem>>
    %58 = vector.broadcast %57 : f32 to vector<1x128xf32>
    %59 = arith.mulf %58, %14 : vector<1x128xf32>
    %60 = arith.addf %56, %59 : vector<1x128xf32>
    %c1_48 = arith.constant 1 : index
    %c3_49 = arith.constant 3 : index
    %61 = memref.load %arg3[%c1_48, %c3_49] : memref<4x4xf32, #tpu.memory_space<smem>>
    %62 = vector.broadcast %61 : f32 to vector<1x128xf32>
    %63 = arith.mulf %62, %18 : vector<1x128xf32>
    %64 = arith.addf %60, %63 : vector<1x128xf32>
    %65 = vector.shape_cast %64 : vector<1x128xf32> to vector<1x1x128xf32>
    %c0_50 = arith.constant 0 : index
    %c1_51 = arith.constant 1 : index
    %c0_52 = arith.constant 0 : index
    %c0_53 = arith.constant 0 : index
    %66 = vector.load %arg4[%c0_50, %c1_51, %c0_52, %c0_53] : memref<1x4x1x128xf32, #tpu.memory_space<vmem>>, vector<1x1x1x128xf32>
    %67 = vector.shape_cast %66 : vector<1x1x1x128xf32> to vector<1x128xf32>
    %cst_54 = arith.constant dense<0.000000e+00> : vector<1x128xf32>
    %68 = vector.multi_reduction <add>, %65, %cst_54 [0] : vector<1x1x128xf32> to vector<1x128xf32>
    %69 = arith.addf %67, %68 : vector<1x128xf32>
    %c0_55 = arith.constant 0 : index
    %c1_56 = arith.constant 1 : index
    %c0_57 = arith.constant 0 : index
    %c0_58 = arith.constant 0 : index
    %70 = vector.load %arg4[%c0_55, %c1_56, %c0_57, %c0_58] : memref<1x4x1x128xf32, #tpu.memory_space<vmem>>, vector<1x1x1x128xf32>
    %71 = vector.shape_cast %70 : vector<1x1x1x128xf32> to vector<1x128xf32>
    %72 = vector.shape_cast %69 : vector<1x128xf32> to vector<1x1x1x128xf32>
    tpu.vector_store %arg4[%c0_55, %c1_56, %c0_57, %c0_58], %72 {strides = array<i32>} : memref<1x4x1x128xf32, #tpu.memory_space<vmem>>, vector<1x1x1x128xf32>,
    %c0_59 = arith.constant 0 : index
    %c1_60 = arith.constant 1 : index
    %c0_61 = arith.constant 0 : index
    %c0_62 = arith.constant 0 : index
    %73 = vector.load %arg5[%c0_59, %c1_60, %c0_61, %c0_62] : memref<1x4x1x128xf32, #tpu.memory_space<vmem>>, vector<1x1x1x128xf32>
    %74 = vector.shape_cast %73 : vector<1x1x1x128xf32> to vector<1x128xf32>
    %75 = arith.mulf %65, %65 : vector<1x1x128xf32>
    %cst_63 = arith.constant dense<0.000000e+00> : vector<1x128xf32>
    %76 = vector.multi_reduction <add>, %75, %cst_63 [0] : vector<1x1x128xf32> to vector<1x128xf32>
    %77 = arith.addf %74, %76 : vector<1x128xf32>
    %c0_64 = arith.constant 0 : index
    %c1_65 = arith.constant 1 : index
    %c0_66 = arith.constant 0 : index
    %c0_67 = arith.constant 0 : index
    %78 = vector.load %arg5[%c0_64, %c1_65, %c0_66, %c0_67] : memref<1x4x1x128xf32, #tpu.memory_space<vmem>>, vector<1x1x1x128xf32>
    %79 = vector.shape_cast %78 : vector<1x1x1x128xf32> to vector<1x128xf32>
    %80 = vector.shape_cast %77 : vector<1x128xf32> to vector<1x1x1x128xf32>
    tpu.vector_store %arg5[%c0_64, %c1_65, %c0_66, %c0_67], %80 {strides = array<i32>} : memref<1x4x1x128xf32, #tpu.memory_space<vmem>>, vector<1x1x1x128xf32>,
    %c2_68 = arith.constant 2 : index
    %c0_69 = arith.constant 0 : index
    %81 = memref.load %arg3[%c2_68, %c0_69] : memref<4x4xf32, #tpu.memory_space<smem>>
    %82 = vector.broadcast %81 : f32 to vector<1x128xf32>
    %83 = arith.mulf %82, %6 : vector<1x128xf32>
    %c2_70 = arith.constant 2 : index
    %c1_71 = arith.constant 1 : index
    %84 = memref.load %arg3[%c2_70, %c1_71] : memref<4x4xf32, #tpu.memory_space<smem>>
    %85 = vector.broadcast %84 : f32 to vector<1x128xf32>
    %86 = arith.mulf %85, %10 : vector<1x128xf32>
    %87 = arith.addf %83, %86 : vector<1x128xf32>
    %c2_72 = arith.constant 2 : index
    %c2_73 = arith.constant 2 : index
    %88 = memref.load %arg3[%c2_72, %c2_73] : memref<4x4xf32, #tpu.memory_space<smem>>
    %89 = vector.broadcast %88 : f32 to vector<1x128xf32>
    %90 = arith.mulf %89, %14 : vector<1x128xf32>
    %91 = arith.addf %87, %90 : vector<1x128xf32>
    %c2_74 = arith.constant 2 : index
    %c3_75 = arith.constant 3 : index
    %92 = memref.load %arg3[%c2_74, %c3_75] : memref<4x4xf32, #tpu.memory_space<smem>>
    %93 = vector.broadcast %92 : f32 to vector<1x128xf32>
    %94 = arith.mulf %93, %18 : vector<1x128xf32>
    %95 = arith.addf %91, %94 : vector<1x128xf32>
    %96 = vector.shape_cast %95 : vector<1x128xf32> to vector<1x1x128xf32>
    %c0_76 = arith.constant 0 : index
    %c2_77 = arith.constant 2 : index
    %c0_78 = arith.constant 0 : index
    %c0_79 = arith.constant 0 : index
    %97 = vector.load %arg4[%c0_76, %c2_77, %c0_78, %c0_79] : memref<1x4x1x128xf32, #tpu.memory_space<vmem>>, vector<1x1x1x128xf32>
    %98 = vector.shape_cast %97 : vector<1x1x1x128xf32> to vector<1x128xf32>
    %cst_80 = arith.constant dense<0.000000e+00> : vector<1x128xf32>
    %99 = vector.multi_reduction <add>, %96, %cst_80 [0] : vector<1x1x128xf32> to vector<1x128xf32>
    %100 = arith.addf %98, %99 : vector<1x128xf32>
    %c0_81 = arith.constant 0 : index
    %c2_82 = arith.constant 2 : index
    %c0_83 = arith.constant 0 : index
    %c0_84 = arith.constant 0 : index
    %101 = vector.load %arg4[%c0_81, %c2_82, %c0_83, %c0_84] : memref<1x4x1x128xf32, #tpu.memory_space<vmem>>, vector<1x1x1x128xf32>
    %102 = vector.shape_cast %101 : vector<1x1x1x128xf32> to vector<1x128xf32>
    %103 = vector.shape_cast %100 : vector<1x128xf32> to vector<1x1x1x128xf32>
    tpu.vector_store %arg4[%c0_81, %c2_82, %c0_83, %c0_84], %103 {strides = array<i32>} : memref<1x4x1x128xf32, #tpu.memory_space<vmem>>, vector<1x1x1x128xf32>,
    %c0_85 = arith.constant 0 : index
    %c2_86 = arith.constant 2 : index
    %c0_87 = arith.constant 0 : index
    %c0_88 = arith.constant 0 : index
    %104 = vector.load %arg5[%c0_85, %c2_86, %c0_87, %c0_88] : memref<1x4x1x128xf32, #tpu.memory_space<vmem>>, vector<1x1x1x128xf32>
    %105 = vector.shape_cast %104 : vector<1x1x1x128xf32> to vector<1x128xf32>
    %106 = arith.mulf %96, %96 : vector<1x1x128xf32>
    %cst_89 = arith.constant dense<0.000000e+00> : vector<1x128xf32>
    %107 = vector.multi_reduction <add>, %106, %cst_89 [0] : vector<1x1x128xf32> to vector<1x128xf32>
    %108 = arith.addf %105, %107 : vector<1x128xf32>
    %c0_90 = arith.constant 0 : index
    %c2_91 = arith.constant 2 : index
    %c0_92 = arith.constant 0 : index
    %c0_93 = arith.constant 0 : index
    %109 = vector.load %arg5[%c0_90, %c2_91, %c0_92, %c0_93] : memref<1x4x1x128xf32, #tpu.memory_space<vmem>>, vector<1x1x1x128xf32>
    %110 = vector.shape_cast %109 : vector<1x1x1x128xf32> to vector<1x128xf32>
    %111 = vector.shape_cast %108 : vector<1x128xf32> to vector<1x1x1x128xf32>
    tpu.vector_store %arg5[%c0_90, %c2_91, %c0_92, %c0_93], %111 {strides = array<i32>} : memref<1x4x1x128xf32, #tpu.memory_space<vmem>>, vector<1x1x1x128xf32>,
    %c3_94 = arith.constant 3 : index
    %c0_95 = arith.constant 0 : index
    %112 = memref.load %arg3[%c3_94, %c0_95] : memref<4x4xf32, #tpu.memory_space<smem>>
    %113 = vector.broadcast %112 : f32 to vector<1x128xf32>
    %114 = arith.mulf %113, %6 : vector<1x128xf32>
    %c3_96 = arith.constant 3 : index
    %c1_97 = arith.constant 1 : index
    %115 = memref.load %arg3[%c3_96, %c1_97] : memref<4x4xf32, #tpu.memory_space<smem>>
    %116 = vector.broadcast %115 : f32 to vector<1x128xf32>
    %117 = arith.mulf %116, %10 : vector<1x128xf32>
    %118 = arith.addf %114, %117 : vector<1x128xf32>
    %c3_98 = arith.constant 3 : index
    %c2_99 = arith.constant 2 : index
    %119 = memref.load %arg3[%c3_98, %c2_99] : memref<4x4xf32, #tpu.memory_space<smem>>
    %120 = vector.broadcast %119 : f32 to vector<1x128xf32>
    %121 = arith.mulf %120, %14 : vector<1x128xf32>
    %122 = arith.addf %118, %121 : vector<1x128xf32>
    %c3_100 = arith.constant 3 : index
    %c3_101 = arith.constant 3 : index
    %123 = memref.load %arg3[%c3_100, %c3_101] : memref<4x4xf32, #tpu.memory_space<smem>>
    %124 = vector.broadcast %123 : f32 to vector<1x128xf32>
    %125 = arith.mulf %124, %18 : vector<1x128xf32>
    %126 = arith.addf %122, %125 : vector<1x128xf32>
    %127 = vector.shape_cast %126 : vector<1x128xf32> to vector<1x1x128xf32>
    %c0_102 = arith.constant 0 : index
    %c3_103 = arith.constant 3 : index
    %c0_104 = arith.constant 0 : index
    %c0_105 = arith.constant 0 : index
    %128 = vector.load %arg4[%c0_102, %c3_103, %c0_104, %c0_105] : memref<1x4x1x128xf32, #tpu.memory_space<vmem>>, vector<1x1x1x128xf32>
    %129 = vector.shape_cast %128 : vector<1x1x1x128xf32> to vector<1x128xf32>
    %cst_106 = arith.constant dense<0.000000e+00> : vector<1x128xf32>
    %130 = vector.multi_reduction <add>, %127, %cst_106 [0] : vector<1x1x128xf32> to vector<1x128xf32>
    %131 = arith.addf %129, %130 : vector<1x128xf32>
    %c0_107 = arith.constant 0 : index
    %c3_108 = arith.constant 3 : index
    %c0_109 = arith.constant 0 : index
    %c0_110 = arith.constant 0 : index
    %132 = vector.load %arg4[%c0_107, %c3_108, %c0_109, %c0_110] : memref<1x4x1x128xf32, #tpu.memory_space<vmem>>, vector<1x1x1x128xf32>
    %133 = vector.shape_cast %132 : vector<1x1x1x128xf32> to vector<1x128xf32>
    %134 = vector.shape_cast %131 : vector<1x128xf32> to vector<1x1x1x128xf32>
    tpu.vector_store %arg4[%c0_107, %c3_108, %c0_109, %c0_110], %134 {strides = array<i32>} : memref<1x4x1x128xf32, #tpu.memory_space<vmem>>, vector<1x1x1x128xf32>,
    %c0_111 = arith.constant 0 : index
    %c3_112 = arith.constant 3 : index
    %c0_113 = arith.constant 0 : index
    %c0_114 = arith.constant 0 : index
    %135 = vector.load %arg5[%c0_111, %c3_112, %c0_113, %c0_114] : memref<1x4x1x128xf32, #tpu.memory_space<vmem>>, vector<1x1x1x128xf32>
    %136 = vector.shape_cast %135 : vector<1x1x1x128xf32> to vector<1x128xf32>
    %137 = arith.mulf %127, %127 : vector<1x1x128xf32>
    %cst_115 = arith.constant dense<0.000000e+00> : vector<1x128xf32>
    %138 = vector.multi_reduction <add>, %137, %cst_115 [0] : vector<1x1x128xf32> to vector<1x128xf32>
    %139 = arith.addf %136, %138 : vector<1x128xf32>
    %c0_116 = arith.constant 0 : index
    %c3_117 = arith.constant 3 : index
    %c0_118 = arith.constant 0 : index
    %c0_119 = arith.constant 0 : index
    %140 = vector.load %arg5[%c0_116, %c3_117, %c0_118, %c0_119] : memref<1x4x1x128xf32, #tpu.memory_space<vmem>>, vector<1x1x1x128xf32>
    %141 = vector.shape_cast %140 : vector<1x1x1x128xf32> to vector<1x128xf32>
    %142 = vector.shape_cast %139 : vector<1x128xf32> to vector<1x1x1x128xf32>
    tpu.vector_store %arg5[%c0_116, %c3_117, %c0_118, %c0_119], %142 {strides = array<i32>} : memref<1x4x1x128xf32, #tpu.memory_space<vmem>>, vector<1x1x1x128xf32>,
    return
  }
  func.func @transform_0(%arg0: i32, %arg1: i32) -> (i32, i32, i32, i32) {
    %c0_i32 = arith.constant 0 : i32
    %c0_i32_0 = arith.constant 0 : i32
    %c0_i32_1 = arith.constant 0 : i32
    return %arg0, %c0_i32, %arg1, %c0_i32_0 : i32, i32, i32, i32
  }
  func.func @transform_1(%arg0: i32, %arg1: i32) -> (i32, i32) {
    %c0_i32 = arith.constant 0 : i32
    %c0_i32_0 = arith.constant 0 : i32
    %c0_i32_1 = arith.constant 0 : i32
    return %c0_i32, %c0_i32_0 : i32, i32
  }
  func.func @transform_2(%arg0: i32, %arg1: i32) -> (i32, i32, i32, i32) {
    %c0_i32 = arith.constant 0 : i32
    %c0_i32_0 = arith.constant 0 : i32
    %c0_i32_1 = arith.constant 0 : i32
    %c0_i32_2 = arith.constant 0 : i32
    return %arg0, %c0_i32, %c0_i32_0, %c0_i32_1 : i32, i32, i32, i32
  }
  func.func @transform_3(%arg0: i32, %arg1: i32) -> (i32, i32, i32, i32) {
    %c0_i32 = arith.constant 0 : i32
    %c0_i32_0 = arith.constant 0 : i32
    %c0_i32_1 = arith.constant 0 : i32
    %c0_i32_2 = arith.constant 0 : i32
    return %arg0, %c0_i32, %c0_i32_0, %c0_i32_1 : i32, i32, i32, i32
  }
}

module attributes {stable_mosaic.version = 11 : i64} {
  func.func @_apply_kernel_small_c(%arg0: i32, %arg1: i32, %arg2: memref<1x4x1x128xf32, #tpu.memory_space<vmem>>, %arg3: memref<4x4xf32, #tpu.memory_space<smem>>, %arg4: memref<4xf32, #tpu.memory_space<smem>>, %arg5: memref<4xf32, #tpu.memory_space<smem>>, %arg6: memref<1x4x1x128xf32, #tpu.memory_space<vmem>>) attributes {dimension_semantics = [#tpu.dimension_semantics<parallel>, #tpu.dimension_semantics<parallel>], iteration_bounds = array<i64: 2, 1>, scalar_prefetch = 0 : i64, scratch_operands = 0 : i64, tpu.core_type = #tpu.core_type<tc>, window_params = [{transform_indices = @transform_0, window_bounds = array<i64: 1, 4, 1, 128>}, {transform_indices = @transform_1, window_bounds = array<i64: 4, 4>}, {transform_indices = @transform_2, window_bounds = array<i64: 4>}, {transform_indices = @transform_3, window_bounds = array<i64: 4>}, {transform_indices = @transform_4, window_bounds = array<i64: 1, 4, 1, 128>}]} {
    %c0 = arith.constant 0 : index
    %c0_0 = arith.constant 0 : index
    %c0_1 = arith.constant 0 : index
    %c0_2 = arith.constant 0 : index
    %0 = vector.load %arg2[%c0, %c0_0, %c0_1, %c0_2] : memref<1x4x1x128xf32, #tpu.memory_space<vmem>>, vector<1x1x1x128xf32>
    %1 = vector.shape_cast %0 : vector<1x1x1x128xf32> to vector<1x128xf32>
    %cst = arith.constant 0.000000e+00 : f32
    %2 = vector.broadcast %cst : f32 to vector<1x128xf32>
    %3 = arith.maximumf %1, %2 : vector<1x128xf32>
    %c0_3 = arith.constant 0 : index
    %c1 = arith.constant 1 : index
    %c0_4 = arith.constant 0 : index
    %c0_5 = arith.constant 0 : index
    %4 = vector.load %arg2[%c0_3, %c1, %c0_4, %c0_5] : memref<1x4x1x128xf32, #tpu.memory_space<vmem>>, vector<1x1x1x128xf32>
    %5 = vector.shape_cast %4 : vector<1x1x1x128xf32> to vector<1x128xf32>
    %cst_6 = arith.constant 0.000000e+00 : f32
    %6 = vector.broadcast %cst_6 : f32 to vector<1x128xf32>
    %7 = arith.maximumf %5, %6 : vector<1x128xf32>
    %c0_7 = arith.constant 0 : index
    %c2 = arith.constant 2 : index
    %c0_8 = arith.constant 0 : index
    %c0_9 = arith.constant 0 : index
    %8 = vector.load %arg2[%c0_7, %c2, %c0_8, %c0_9] : memref<1x4x1x128xf32, #tpu.memory_space<vmem>>, vector<1x1x1x128xf32>
    %9 = vector.shape_cast %8 : vector<1x1x1x128xf32> to vector<1x128xf32>
    %cst_10 = arith.constant 0.000000e+00 : f32
    %10 = vector.broadcast %cst_10 : f32 to vector<1x128xf32>
    %11 = arith.maximumf %9, %10 : vector<1x128xf32>
    %c0_11 = arith.constant 0 : index
    %c3 = arith.constant 3 : index
    %c0_12 = arith.constant 0 : index
    %c0_13 = arith.constant 0 : index
    %12 = vector.load %arg2[%c0_11, %c3, %c0_12, %c0_13] : memref<1x4x1x128xf32, #tpu.memory_space<vmem>>, vector<1x1x1x128xf32>
    %13 = vector.shape_cast %12 : vector<1x1x1x128xf32> to vector<1x128xf32>
    %cst_14 = arith.constant 0.000000e+00 : f32
    %14 = vector.broadcast %cst_14 : f32 to vector<1x128xf32>
    %15 = arith.maximumf %13, %14 : vector<1x128xf32>
    %c0_15 = arith.constant 0 : index
    %c0_16 = arith.constant 0 : index
    %16 = memref.load %arg3[%c0_15, %c0_16] : memref<4x4xf32, #tpu.memory_space<smem>>
    %17 = vector.broadcast %16 : f32 to vector<1x128xf32>
    %18 = arith.mulf %17, %3 : vector<1x128xf32>
    %c0_17 = arith.constant 0 : index
    %c1_18 = arith.constant 1 : index
    %19 = memref.load %arg3[%c0_17, %c1_18] : memref<4x4xf32, #tpu.memory_space<smem>>
    %20 = vector.broadcast %19 : f32 to vector<1x128xf32>
    %21 = arith.mulf %20, %7 : vector<1x128xf32>
    %22 = arith.addf %18, %21 : vector<1x128xf32>
    %c0_19 = arith.constant 0 : index
    %c2_20 = arith.constant 2 : index
    %23 = memref.load %arg3[%c0_19, %c2_20] : memref<4x4xf32, #tpu.memory_space<smem>>
    %24 = vector.broadcast %23 : f32 to vector<1x128xf32>
    %25 = arith.mulf %24, %11 : vector<1x128xf32>
    %26 = arith.addf %22, %25 : vector<1x128xf32>
    %c0_21 = arith.constant 0 : index
    %c3_22 = arith.constant 3 : index
    %27 = memref.load %arg3[%c0_21, %c3_22] : memref<4x4xf32, #tpu.memory_space<smem>>
    %28 = vector.broadcast %27 : f32 to vector<1x128xf32>
    %29 = arith.mulf %28, %15 : vector<1x128xf32>
    %30 = arith.addf %26, %29 : vector<1x128xf32>
    %c0_23 = arith.constant 0 : index
    %31 = memref.load %arg4[%c0_23] : memref<4xf32, #tpu.memory_space<smem>>
    %32 = vector.broadcast %31 : f32 to vector<1x128xf32>
    %33 = arith.mulf %30, %32 : vector<1x128xf32>
    %c0_24 = arith.constant 0 : index
    %34 = memref.load %arg5[%c0_24] : memref<4xf32, #tpu.memory_space<smem>>
    %35 = vector.broadcast %34 : f32 to vector<1x128xf32>
    %36 = arith.addf %33, %35 : vector<1x128xf32>
    %c0_25 = arith.constant 0 : index
    %c0_26 = arith.constant 0 : index
    %c0_27 = arith.constant 0 : index
    %c0_28 = arith.constant 0 : index
    %37 = vector.load %arg6[%c0_25, %c0_26, %c0_27, %c0_28] : memref<1x4x1x128xf32, #tpu.memory_space<vmem>>, vector<1x1x1x128xf32>
    %38 = vector.shape_cast %37 : vector<1x1x1x128xf32> to vector<1x128xf32>
    %39 = vector.shape_cast %36 : vector<1x128xf32> to vector<1x1x1x128xf32>
    tpu.vector_store %arg6[%c0_25, %c0_26, %c0_27, %c0_28], %39 {strides = array<i32>} : memref<1x4x1x128xf32, #tpu.memory_space<vmem>>, vector<1x1x1x128xf32>,
    %c1_29 = arith.constant 1 : index
    %c0_30 = arith.constant 0 : index
    %40 = memref.load %arg3[%c1_29, %c0_30] : memref<4x4xf32, #tpu.memory_space<smem>>
    %41 = vector.broadcast %40 : f32 to vector<1x128xf32>
    %42 = arith.mulf %41, %3 : vector<1x128xf32>
    %c1_31 = arith.constant 1 : index
    %c1_32 = arith.constant 1 : index
    %43 = memref.load %arg3[%c1_31, %c1_32] : memref<4x4xf32, #tpu.memory_space<smem>>
    %44 = vector.broadcast %43 : f32 to vector<1x128xf32>
    %45 = arith.mulf %44, %7 : vector<1x128xf32>
    %46 = arith.addf %42, %45 : vector<1x128xf32>
    %c1_33 = arith.constant 1 : index
    %c2_34 = arith.constant 2 : index
    %47 = memref.load %arg3[%c1_33, %c2_34] : memref<4x4xf32, #tpu.memory_space<smem>>
    %48 = vector.broadcast %47 : f32 to vector<1x128xf32>
    %49 = arith.mulf %48, %11 : vector<1x128xf32>
    %50 = arith.addf %46, %49 : vector<1x128xf32>
    %c1_35 = arith.constant 1 : index
    %c3_36 = arith.constant 3 : index
    %51 = memref.load %arg3[%c1_35, %c3_36] : memref<4x4xf32, #tpu.memory_space<smem>>
    %52 = vector.broadcast %51 : f32 to vector<1x128xf32>
    %53 = arith.mulf %52, %15 : vector<1x128xf32>
    %54 = arith.addf %50, %53 : vector<1x128xf32>
    %c1_37 = arith.constant 1 : index
    %55 = memref.load %arg4[%c1_37] : memref<4xf32, #tpu.memory_space<smem>>
    %56 = vector.broadcast %55 : f32 to vector<1x128xf32>
    %57 = arith.mulf %54, %56 : vector<1x128xf32>
    %c1_38 = arith.constant 1 : index
    %58 = memref.load %arg5[%c1_38] : memref<4xf32, #tpu.memory_space<smem>>
    %59 = vector.broadcast %58 : f32 to vector<1x128xf32>
    %60 = arith.addf %57, %59 : vector<1x128xf32>
    %c0_39 = arith.constant 0 : index
    %c1_40 = arith.constant 1 : index
    %c0_41 = arith.constant 0 : index
    %c0_42 = arith.constant 0 : index
    %61 = vector.load %arg6[%c0_39, %c1_40, %c0_41, %c0_42] : memref<1x4x1x128xf32, #tpu.memory_space<vmem>>, vector<1x1x1x128xf32>
    %62 = vector.shape_cast %61 : vector<1x1x1x128xf32> to vector<1x128xf32>
    %63 = vector.shape_cast %60 : vector<1x128xf32> to vector<1x1x1x128xf32>
    tpu.vector_store %arg6[%c0_39, %c1_40, %c0_41, %c0_42], %63 {strides = array<i32>} : memref<1x4x1x128xf32, #tpu.memory_space<vmem>>, vector<1x1x1x128xf32>,
    %c2_43 = arith.constant 2 : index
    %c0_44 = arith.constant 0 : index
    %64 = memref.load %arg3[%c2_43, %c0_44] : memref<4x4xf32, #tpu.memory_space<smem>>
    %65 = vector.broadcast %64 : f32 to vector<1x128xf32>
    %66 = arith.mulf %65, %3 : vector<1x128xf32>
    %c2_45 = arith.constant 2 : index
    %c1_46 = arith.constant 1 : index
    %67 = memref.load %arg3[%c2_45, %c1_46] : memref<4x4xf32, #tpu.memory_space<smem>>
    %68 = vector.broadcast %67 : f32 to vector<1x128xf32>
    %69 = arith.mulf %68, %7 : vector<1x128xf32>
    %70 = arith.addf %66, %69 : vector<1x128xf32>
    %c2_47 = arith.constant 2 : index
    %c2_48 = arith.constant 2 : index
    %71 = memref.load %arg3[%c2_47, %c2_48] : memref<4x4xf32, #tpu.memory_space<smem>>
    %72 = vector.broadcast %71 : f32 to vector<1x128xf32>
    %73 = arith.mulf %72, %11 : vector<1x128xf32>
    %74 = arith.addf %70, %73 : vector<1x128xf32>
    %c2_49 = arith.constant 2 : index
    %c3_50 = arith.constant 3 : index
    %75 = memref.load %arg3[%c2_49, %c3_50] : memref<4x4xf32, #tpu.memory_space<smem>>
    %76 = vector.broadcast %75 : f32 to vector<1x128xf32>
    %77 = arith.mulf %76, %15 : vector<1x128xf32>
    %78 = arith.addf %74, %77 : vector<1x128xf32>
    %c2_51 = arith.constant 2 : index
    %79 = memref.load %arg4[%c2_51] : memref<4xf32, #tpu.memory_space<smem>>
    %80 = vector.broadcast %79 : f32 to vector<1x128xf32>
    %81 = arith.mulf %78, %80 : vector<1x128xf32>
    %c2_52 = arith.constant 2 : index
    %82 = memref.load %arg5[%c2_52] : memref<4xf32, #tpu.memory_space<smem>>
    %83 = vector.broadcast %82 : f32 to vector<1x128xf32>
    %84 = arith.addf %81, %83 : vector<1x128xf32>
    %c0_53 = arith.constant 0 : index
    %c2_54 = arith.constant 2 : index
    %c0_55 = arith.constant 0 : index
    %c0_56 = arith.constant 0 : index
    %85 = vector.load %arg6[%c0_53, %c2_54, %c0_55, %c0_56] : memref<1x4x1x128xf32, #tpu.memory_space<vmem>>, vector<1x1x1x128xf32>
    %86 = vector.shape_cast %85 : vector<1x1x1x128xf32> to vector<1x128xf32>
    %87 = vector.shape_cast %84 : vector<1x128xf32> to vector<1x1x1x128xf32>
    tpu.vector_store %arg6[%c0_53, %c2_54, %c0_55, %c0_56], %87 {strides = array<i32>} : memref<1x4x1x128xf32, #tpu.memory_space<vmem>>, vector<1x1x1x128xf32>,
    %c3_57 = arith.constant 3 : index
    %c0_58 = arith.constant 0 : index
    %88 = memref.load %arg3[%c3_57, %c0_58] : memref<4x4xf32, #tpu.memory_space<smem>>
    %89 = vector.broadcast %88 : f32 to vector<1x128xf32>
    %90 = arith.mulf %89, %3 : vector<1x128xf32>
    %c3_59 = arith.constant 3 : index
    %c1_60 = arith.constant 1 : index
    %91 = memref.load %arg3[%c3_59, %c1_60] : memref<4x4xf32, #tpu.memory_space<smem>>
    %92 = vector.broadcast %91 : f32 to vector<1x128xf32>
    %93 = arith.mulf %92, %7 : vector<1x128xf32>
    %94 = arith.addf %90, %93 : vector<1x128xf32>
    %c3_61 = arith.constant 3 : index
    %c2_62 = arith.constant 2 : index
    %95 = memref.load %arg3[%c3_61, %c2_62] : memref<4x4xf32, #tpu.memory_space<smem>>
    %96 = vector.broadcast %95 : f32 to vector<1x128xf32>
    %97 = arith.mulf %96, %11 : vector<1x128xf32>
    %98 = arith.addf %94, %97 : vector<1x128xf32>
    %c3_63 = arith.constant 3 : index
    %c3_64 = arith.constant 3 : index
    %99 = memref.load %arg3[%c3_63, %c3_64] : memref<4x4xf32, #tpu.memory_space<smem>>
    %100 = vector.broadcast %99 : f32 to vector<1x128xf32>
    %101 = arith.mulf %100, %15 : vector<1x128xf32>
    %102 = arith.addf %98, %101 : vector<1x128xf32>
    %c3_65 = arith.constant 3 : index
    %103 = memref.load %arg4[%c3_65] : memref<4xf32, #tpu.memory_space<smem>>
    %104 = vector.broadcast %103 : f32 to vector<1x128xf32>
    %105 = arith.mulf %102, %104 : vector<1x128xf32>
    %c3_66 = arith.constant 3 : index
    %106 = memref.load %arg5[%c3_66] : memref<4xf32, #tpu.memory_space<smem>>
    %107 = vector.broadcast %106 : f32 to vector<1x128xf32>
    %108 = arith.addf %105, %107 : vector<1x128xf32>
    %c0_67 = arith.constant 0 : index
    %c3_68 = arith.constant 3 : index
    %c0_69 = arith.constant 0 : index
    %c0_70 = arith.constant 0 : index
    %109 = vector.load %arg6[%c0_67, %c3_68, %c0_69, %c0_70] : memref<1x4x1x128xf32, #tpu.memory_space<vmem>>, vector<1x1x1x128xf32>
    %110 = vector.shape_cast %109 : vector<1x1x1x128xf32> to vector<1x128xf32>
    %111 = vector.shape_cast %108 : vector<1x128xf32> to vector<1x1x1x128xf32>
    tpu.vector_store %arg6[%c0_67, %c3_68, %c0_69, %c0_70], %111 {strides = array<i32>} : memref<1x4x1x128xf32, #tpu.memory_space<vmem>>, vector<1x1x1x128xf32>,
    return
  }
  func.func @transform_0(%arg0: i32, %arg1: i32) -> (i32, i32, i32, i32) {
    %c0_i32 = arith.constant 0 : i32
    %c0_i32_0 = arith.constant 0 : i32
    %c0_i32_1 = arith.constant 0 : i32
    return %arg0, %c0_i32, %arg1, %c0_i32_0 : i32, i32, i32, i32
  }
  func.func @transform_1(%arg0: i32, %arg1: i32) -> (i32, i32) {
    %c0_i32 = arith.constant 0 : i32
    %c0_i32_0 = arith.constant 0 : i32
    %c0_i32_1 = arith.constant 0 : i32
    return %c0_i32, %c0_i32_0 : i32, i32
  }
  func.func @transform_2(%arg0: i32, %arg1: i32) -> i32 {
    %c0_i32 = arith.constant 0 : i32
    %c0_i32_0 = arith.constant 0 : i32
    return %c0_i32 : i32
  }
  func.func @transform_3(%arg0: i32, %arg1: i32) -> i32 {
    %c0_i32 = arith.constant 0 : i32
    %c0_i32_0 = arith.constant 0 : i32
    return %c0_i32 : i32
  }
  func.func @transform_4(%arg0: i32, %arg1: i32) -> (i32, i32, i32, i32) {
    %c0_i32 = arith.constant 0 : i32
    %c0_i32_0 = arith.constant 0 : i32
    %c0_i32_1 = arith.constant 0 : i32
    return %arg0, %c0_i32, %arg1, %c0_i32_0 : i32, i32, i32, i32
  }
}

</mosaic_0001>

<bundles_post_ra>
// kernel: preprocess_x.3
= control target key start
LH: loop header
LB: loop body
LE: loop exit
PB: predicated region body
PF: predicated region fallthrough
CT: control target
= control target key end

     0   :  { %9 = vsyncpa [#allocation3], 0  ;;  %s791_s0 = inlined_call_operand.vmem [shape: f32[2,4,1,128], index: 0, kind: input, shape index: {}]   ;;  %s792_s1 = inlined_call_operand.vmem [shape: f32[4,4], index: 1, kind: input, shape index: {}]   ;;  %s793_s2 = inlined_call_operand.vmem [shape: f32[4], index: 2, kind: input, shape index: {}]   ;;  %s794_s3 = inlined_call_operand.vmem [shape: f32[4], index: 3, kind: input, shape index: {}]   ;;  %s795_s4 = inlined_call_operand.vmem [shape: f32[2,4,1,128], index: 4, kind: output, shape index: {}]  }
   0x1   :  { %10 = vsyncpa [#allocation5], 0  ;;  %s673_s15 = smov 0   ;;  %s675_s16 = smov 0  }
   0x2   :  { %s677_s17 = smov 0  }
   0x3 LB: > { %s174_s20 = sshll.u32 %s793_s2, 4  ;;  %s471_s21 = sadd.s32 4294967295, %s643_s17   ;;  %s643_s17 = sphi %s677_s17, %s16_s17   ;;  %s639_s16 = sphi %s675_s16, %s799_s16   ;;  %s635_s15 = sphi %s673_s15, %s798_s15   ;;  %s175_s20 = int_to_ptr.vmem [resolvable:$true] %s174_s20 }
   0x4   : > { %p473_p0 = scmp.ge.s32.totalorder %s643_s17, 1  ;;  %p152_p1 = scmp.lt.s32.totalorder %s643_s17, 3 }
   0x5   : > { %p694_p2 = scmp.eq.s32.totalorder %s471_s21, 0  ;;  %s28_s24 = sadd.s32 1, %s639_s16 }
   0x6   : > { %p698_p3 = pnand %p473_p0, %p152_p1  ;;  %s164_s27 = sshll.u32 %s792_s1, 4  ;;  %s165_s27 = int_to_ptr.vmem [resolvable:$true] %s164_s27 }
   0x7   : > { %p30_p6 = scmp.ge.s32.totalorder %s28_s24, 2  ;;  %s184_s30 = sshll.u32 %s794_s3, 4  ;;  %s185_s30 = int_to_ptr.vmem [resolvable:$true] %s184_s30 }
   0x8   : > { %p525_p4 = pneg %p698_p3  ;;  %s645_s5 = smov [#allocation4]  }
   0x9   : > { %s801_s24 = smov (%p30_p6, %s28_s24), 0  ;;  %s646_s6 = smov [#allocation2]  }
   0xa   : > { %p526_p5 = pnand %p694_p2, %p525_p4  ;;  %s647_s7 = smov [#allocation6]  }
   0xb   : > { %207 = sbr.rel (%p698_p3) target bundleno = 61 (0x3d), region = 36 }
   0xc   : > { %531 = dma.vmem_to_smem (!%p526_p5), %s175_s20, 16, %s645_s5, [#allocation5]  }
   0xd   : > { %528 = dma.vmem_to_smem (!%p526_p5), %s165_s27, 64, %s646_s6, [#allocation3]  }
   0xe   : > { %534 = dma.vmem_to_smem (!%p526_p5), %s185_s30, 16, %s647_s7, [#allocation5]  }
  0x10   : > { %626 = dma.done.wait (%p694_p2), [#allocation3], 64  }
  0x11   : > { %628 = vsyncadd (%p694_p2), [#allocation3], 4294967232 }
  0x12   : > { %630 = dma.done.wait (%p694_p2), [#allocation5], 32  }
  0x13   : > { %632 = vsyncadd (%p694_p2), [#allocation5], 4294967264 }
  0x14   : > { %224 = sfence }
  0x15   : > { %p249_p7 = scmp.lt.s32.totalorder %s635_s15, 1  ;;  %s274_s8 = sld [smem:[#allocation2]] }
  0x16   : > { %s487_s9 = sld [smem:[#allocation2 + $0x1]] }
  0x17   : > { %s803_s15 = smov (!%p249_p7, %s635_s15), 1  ;;  %s488_s10 = sld [smem:[#allocation2 + $0x2]] }
  0x18   : > { %s482_s11 = sshll.u32 %s803_s15, 2  ;;  %s489_s12 = sld [smem:[#allocation2 + $0x3]] }
  0x19   : > { %s255_s18 = scalar_lea.vmem %s791_s0, %s482_s11  ;;  %s289_s19 = sld [smem:[#allocation4]] }
  0x1a   : > { %v263_v0 = vld [vmem:[%s255_s18] sm:$0x1]  ;;  %v484_v1 = vld [vmem:[%s255_s18 + $0x1] sm:$0x1]  ;;  %v485_v2 = vld [vmem:[%s255_s18 + $0x2] sm:$0x1]  ;;  %s757_s6 = scalar_lea.vmem %s795_s4, %s482_s11 }
  0x1b   : > { %v275_v3 = vstv %s274_s8  ;;  %v735_v4 = vmax.f32 %v263_v0, 0.0  ;;  %v737_v5 = vmax.f32 %v484_v1, 0.0  ;;  %v739_v6 = vmax.f32 %v485_v2, 0.0  ;;  %v486_v7 = vld [vmem:[%s255_s18 + $0x3] sm:$0x1]  ;;  %s292_s20 = sld [smem:[#allocation6]] }
  0x1c   : > { %v278_v8 = vstv %s487_s9  ;;  %v741_v9 = vmax.f32 %v486_v7, 0.0  ;;  %s490_s21 = sld [smem:[#allocation2 + $0x80]] }
  0x1d   : > { %v276_v10 = vmul.f32 %v275_v3, %v735_v4  ;;  %v279_v11 = vmul.f32 %v278_v8, %v737_v5  ;;  %v282_v12 = vstv %s488_s10  ;;  %s491_s22 = sld [smem:[#allocation2 + $0x81]] }
  0x1e   : > { %v283_v13 = vmul.f32 %v282_v12, %v739_v6  ;;  %v286_v14 = vstv %s489_s12  ;;  %s492_s23 = sld [smem:[#allocation2 + $0x82]] }
  0x1f   : > { %v280_v15 = vadd.f32 %v279_v11, %v276_v10  ;;  %v287_v16 = vmul.f32 %v286_v14, %v741_v9  ;;  %s493_s25 = sld [smem:[#allocation2 + $0x83]]  ;;  %v290_v18 = vstv %s289_s19 }
  0x20   : > { %s747_s26 = sld [smem:[#allocation4 + $0x1]] }
  0x21   : > { %v284_v17 = vadd.f32 %v283_v13, %v280_v15  ;;  %s749_s27 = sld [smem:[#allocation6 + $0x1]]  ;;  %v293_v20 = vstv %s292_s20 }
  0x22   : > { %v297_v21 = vstv %s490_s21  ;;  %s497_s28 = sld [smem:[#allocation2 + $0x100]] }
  0x23   : > { %v288_v19 = vadd.f32 %v287_v16, %v284_v17  ;;  %v298_v23 = vmul.f32 %v297_v21, %v735_v4  ;;  %v300_v24 = vstv %s491_s22  ;;  %s498_s29 = sld [smem:[#allocation2 + $0x101]] }
  0x24   : > { %v301_v25 = vmul.f32 %v300_v24, %v737_v5  ;;  %v304_v26 = vstv %s492_s23  ;;  %s499_s7 = sld [smem:[#allocation2 + $0x102]] }
  0x25   : > { %v291_v22 = vmul.f32 %v290_v18, %v288_v19  ;;  %v305_v28 = vmul.f32 %v304_v26, %v739_v6  ;;  %v308_v29 = vstv %s493_s25  ;;  %s500_s8 = sld [smem:[#allocation2 + $0x103]] }
  0x26   : > { %v302_v30 = vadd.f32 %v301_v25, %v298_v23  ;;  %v309_v31 = vmul.f32 %v308_v29, %v741_v9  ;;  %s762_s15 = sld [smem:[#allocation4 + $0x2]]  ;;  %v312_v34 = vstv %s747_s26 }
  0x27   : > { %v294_v27 = vadd.f32 %v293_v20, %v291_v22  ;;  %s765_s9 = sld [smem:[#allocation6 + $0x2]]  ;;  %v315_v40 = vstv %s749_s27 }
  0x28   : > { %v306_v32 = vadd.f32 %v305_v28, %v302_v30  ;;  %v320_v33 = vstv %s497_s28  ;;  %s504_s10 = sld [smem:[#allocation2 + $0x180]] }
  0x29   : > { %295 = vst [vmem:[%s757_s6] sm:$0x1] %v294_v27  ;;  %v321_v35 = vmul.f32 %v320_v33, %v735_v4  ;;  %v323_v36 = vstv %s498_s29  ;;  %s505_s11 = sld [smem:[#allocation2 + $0x181]] }
  0x2a   : > { %v310_v37 = vadd.f32 %v309_v31, %v306_v32  ;;  %v324_v38 = vmul.f32 %v323_v36, %v737_v5  ;;  %v327_v39 = vstv %s499_s7  ;;  %s506_s12 = sld [smem:[#allocation2 + $0x182]] }
  0x2b   : > { %v328_v41 = vmul.f32 %v327_v39, %v739_v6  ;;  %v331_v42 = vstv %s500_s8  ;;  %s507_s13 = sld [smem:[#allocation2 + $0x183]] }
  0x2c   : > { %v313_v43 = vmul.f32 %v312_v34, %v310_v37  ;;  %v325_v44 = vadd.f32 %v324_v38, %v321_v35  ;;  %v332_v45 = vmul.f32 %v331_v42, %v741_v9  ;;  %s508_s14 = sld [smem:[#allocation4 + $0x3]]  ;;  %v335_v49 = vstv %s762_s15 }
  0x2d   : > { %s509_s18 = sld [smem:[#allocation6 + $0x3]]  ;;  %v338_v55 = vstv %s765_s9 }
  0x2e   : > { %v316_v46 = vadd.f32 %v315_v40, %v313_v43  ;;  %v329_v47 = vadd.f32 %v328_v41, %v325_v44  ;;  %v343_v48 = vstv %s504_s10 }
  0x2f   : > { %v344_v50 = vmul.f32 %v343_v48, %v735_v4  ;;  %v346_v51 = vstv %s505_s11 }
  0x30   : > { %496 = vst [vmem:[%s757_s6 + $0x1] sm:$0x1] %v316_v46  ;;  %v333_v52 = vadd.f32 %v332_v45, %v329_v47  ;;  %v347_v53 = vmul.f32 %v346_v51, %v737_v5  ;;  %v350_v54 = vstv %s506_s12 }
  0x31   : > { %v351_v56 = vmul.f32 %v350_v54, %v739_v6  ;;  %v354_v57 = vstv %s507_s13 }
  0x32   : > { %v336_v58 = vmul.f32 %v335_v49, %v333_v52  ;;  %v348_v59 = vadd.f32 %v347_v53, %v344_v50  ;;  %v355_v60 = vmul.f32 %v354_v57, %v741_v9  ;;  %v358_v63 = vstv %s508_s14 }
  0x33   : > { %v361_v1 = vstv %s509_s18 }
  0x34   : > { %v339_v61 = vadd.f32 %v338_v55, %v336_v58  ;;  %v352_v62 = vadd.f32 %v351_v56, %v348_v59 }
  0x36   : > { %503 = vst [vmem:[%s757_s6 + $0x2] sm:$0x1] %v339_v61  ;;  %v356_v0 = vadd.f32 %v355_v60, %v352_v62 }
  0x38   : > { %v359_v2 = vmul.f32 %v358_v63, %v356_v0 }
  0x3a   : > { %v362_v3 = vadd.f32 %v361_v1, %v359_v2 }
  0x3c   : > { %510 = vst [vmem:[%s757_s6 + $0x3] sm:$0x1] %v362_v3 }
  0x3d PF: > { %s16_s17 = sadd.s32 1, %s643_s17   ;;  %s798_s15 = smov %s639_s16 }
  0x3e   : > { %p13_p8 = scmp.ge.s32.totalorder %s16_s17, 4   ;;  %s799_s16 = smov %s801_s24 }
  0x40   :  { %15 = sbr.rel (!%p13_p8) target bundleno = 3 (0x3), region = 85 }
  0x45   :  { %390 = vsyncpa [#allocation3], 1 }
  0x46   :  { %392 = vsyncpa [#allocation3 + $0x1], 1 }
  0x47   :  { %393 = vsyncpa [#allocation5], 1 }

// kernel: preprocess_x.2
= control target key start
LH: loop header
LB: loop body
LE: loop exit
PB: predicated region body
PF: predicated region fallthrough
CT: control target
= control target key end

     0   :  { %9 = vsyncpa [#allocation3], 0  ;;  %s590_s12 = smov 0   ;;  %s592_s13 = smov 0   ;;  %s685_s0 = inlined_call_operand.vmem [shape: f32[2,4,1,128], index: 0, kind: input, shape index: {}]   ;;  %s686_s1 = inlined_call_operand.vmem [shape: f32[4,4], index: 1, kind: input, shape index: {}]   ;;  %s687_s2 = inlined_call_operand.vmem [shape: f32[2,4,1,128], index: 2, kind: output, shape index: {0}]   ;;  %s688_s3 = inlined_call_operand.vmem [shape: f32[2,4,1,128], index: 3, kind: output, shape index: {1}]  }
   0x1   :  { %s594_s14 = smov 0  }
   0x2 LB: > { %s447_s15 = sadd.s32 4294967295, %s566_s14   ;;  %s27_s16 = sadd.s32 1, %s562_s13  ;;  %s566_s14 = sphi %s594_s14, %s15_s14   ;;  %s562_s13 = sphi %s592_s13, %s690_s13   ;;  %s558_s12 = sphi %s590_s12, %s689_s12  }
   0x3   : > { %p29_p0 = scmp.ge.s32.totalorder %s27_s16, 2  ;;  %p449_p1 = scmp.ge.s32.totalorder %s566_s14, 1 }
   0x4   : > { %p133_p2 = scmp.lt.s32.totalorder %s566_s14, 3  ;;  %p497_p4 = scmp.eq.s32.totalorder %s447_s15, 0 }
   0x5   : > { %s692_s16 = smov (%p29_p0, %s27_s16), 0  ;;  %s145_s19 = sshll.u32 %s686_s1, 4  ;;  %s146_s19 = int_to_ptr.vmem [resolvable:$true] %s145_s19 }
   0x6   : > { %p134_p3 = pnand %p449_p1, %p133_p2  ;;  %s568_s20 = smov [#allocation2]  }
   0x8   : > { %p493_p5 = pneg %p134_p3  ;;  %168 = sbr.rel (%p134_p3) target bundleno = 52 (0x34), region = 28 }
   0xa   : > { %p494_p6 = pnand %p497_p4, %p493_p5 }
   0xc   : > { %496 = dma.vmem_to_smem (!%p494_p6), %s146_s19, 64, %s568_s20, [#allocation3]  }
   0xd   : > { %553 = dma.done.wait (%p497_p4), [#allocation3], 64  }
   0xe   : > { %555 = vsyncadd (%p497_p4), [#allocation3], 4294967232 }
   0xf   : > { %175 = sfence }
  0x10   : > { %p199_p7 = scmp.lt.s32.totalorder %s558_s12, 1  ;;  %s237_s21 = sld [smem:[#allocation2]]  ;;  %v569_v0 = vmov 0.0  }
  0x11   : > { %s460_s22 = sld [smem:[#allocation2 + $0x1]] }
  0x12   : > { %s694_s12 = smov (!%p199_p7, %s558_s12), 1  ;;  %s461_s23 = sld [smem:[#allocation2 + $0x2]] }
  0x13   : > { %s454_s24 = sshll.u32 %s694_s12, 2  ;;  %s612_s25 = sld [smem:[#allocation2 + $0x3]] }
  0x14   : > { %s617_s28 = scalar_lea.vmem %s687_s2, %s454_s24  ;;  %s205_s4 = scalar_lea.vmem %s685_s0, %s454_s24 }
  0x15   : > { %218 = vst [vmem:[%s617_s28] sm:$0x1] %v569_v0  ;;  %s623_s5 = sld [smem:[#allocation2 + $0x80]]  ;;  %s629_s8 = scalar_lea.vmem %s688_s3, %s454_s24  ;;  %v226_v2 = vld [vmem:[%s205_s4] sm:$0x1]  ;;  %v457_v3 = vld [vmem:[%s205_s4 + $0x1] sm:$0x1] }
  0x16   : > { %v238_v1 = vstv %s237_s21  ;;  %219 = vst [vmem:[%s617_s28 + $0x1] sm:$0x1] %v569_v0  ;;  %v227_v5 = vmax.f32 %v226_v2, 0.0  ;;  %v632_v6 = vmax.f32 %v457_v3, 0.0  ;;  %v458_v7 = vld [vmem:[%s205_s4 + $0x2] sm:$0x1] }
  0x17   : > { %v241_v4 = vstv %s460_s22  ;;  %220 = vst [vmem:[%s617_s28 + $0x2] sm:$0x1] %v569_v0  ;;  %v635_v8 = vmax.f32 %v458_v7, 0.0  ;;  %v459_v9 = vld [vmem:[%s205_s4 + $0x3] sm:$0x1]  ;;  %s464_s9 = sld [smem:[#allocation2 + $0x81]] }
  0x18   : > { %221 = vst [vmem:[%s617_s28 + $0x3] sm:$0x1] %v569_v0  ;;  %v245_v10 = vstv %s461_s23  ;;  %v638_v11 = vmax.f32 %v459_v9, 0.0  ;;  %v239_v12 = vmul.f32 %v238_v1, %v227_v5  ;;  %v242_v13 = vmul.f32 %v241_v4, %v632_v6  ;;  %s465_s10 = sld [smem:[#allocation2 + $0x82]] }
  0x19   : > { %222 = vst [vmem:[%s629_s8] sm:$0x1] %v569_v0  ;;  %v249_v14 = vstv %s612_s25  ;;  %v246_v15 = vmul.f32 %v245_v10, %v635_v8  ;;  %s466_s11 = sld [smem:[#allocation2 + $0x83]] }
  0x1a   : > { %223 = vst [vmem:[%s629_s8 + $0x1] sm:$0x1] %v569_v0  ;;  %v243_v16 = vadd.f32 %v242_v13, %v239_v12  ;;  %v250_v17 = vmul.f32 %v249_v14, %v638_v11  ;;  %s471_s12 = sld [smem:[#allocation2 + $0x100]] }
  0x1b   : > { %224 = vst [vmem:[%s629_s8 + $0x2] sm:$0x1] %v569_v0  ;;  %v262_v18 = vstv %s623_s5  ;;  %s472_s15 = sld [smem:[#allocation2 + $0x101]] }
  0x1c   : > { %225 = vst [vmem:[%s629_s8 + $0x3] sm:$0x1] %v569_v0  ;;  %v247_v19 = vadd.f32 %v246_v15, %v243_v16  ;;  %v252_v20 = vld [vmem:[%s617_s28] sm:$0x1]  ;;  %v263_v21 = vmul.f32 %v262_v18, %v227_v5  ;;  %s473_s17 = sld [smem:[#allocation2 + $0x102]] }
  0x1d   : > { %v265_v23 = vstv %s464_s9  ;;  %s474_s18 = sld [smem:[#allocation2 + $0x103]]  ;;  %v467_v40 = vld [vmem:[%s617_s28 + $0x1] sm:$0x1] }
  0x1e   : > { %v251_v22 = vadd.f32 %v250_v17, %v247_v19  ;;  %v266_v25 = vmul.f32 %v265_v23, %v632_v6  ;;  %v269_v26 = vstv %s465_s10  ;;  %s479_s19 = sld [smem:[#allocation2 + $0x180]]  ;;  %v475_v54 = vld [vmem:[%s617_s28 + $0x2] sm:$0x1] }
  0x1f   : > { %v270_v29 = vmul.f32 %v269_v26, %v635_v8  ;;  %v273_v30 = vstv %s466_s11  ;;  %s480_s20 = sld [smem:[#allocation2 + $0x181]]  ;;  %v483_v2 = vld [vmem:[%s617_s28 + $0x3] sm:$0x1] }
  0x20   : > { %v256_v24 = vld [vmem:[%s629_s8] sm:$0x1]  ;;  %v254_v27 = vadd.f32 %v252_v20, %v251_v22  ;;  %v257_v28 = vmul.f32 %v251_v22, %v251_v22  ;;  %v267_v31 = vadd.f32 %v266_v25, %v263_v21  ;;  %v274_v32 = vmul.f32 %v273_v30, %v638_v11  ;;  %s653_s21 = sld [smem:[#allocation2 + $0x182]] }
  0x21   : > { %v288_v33 = vstv %s471_s12  ;;  %v291_v36 = vstv %s472_s15  ;;  %s482_s22 = sld [smem:[#allocation2 + $0x183]]  ;;  %v469_v47 = vld [vmem:[%s629_s8 + $0x1] sm:$0x1] }
  0x22   : > { %255 = vst [vmem:[%s617_s28] sm:$0x1] %v254_v27  ;;  %v259_v34 = vadd.f32 %v257_v28, %v256_v24  ;;  %v289_v35 = vmul.f32 %v288_v33, %v227_v5  ;;  %v271_v37 = vadd.f32 %v270_v29, %v267_v31  ;;  %v292_v38 = vmul.f32 %v291_v36, %v632_v6  ;;  %v477_v61 = vld [vmem:[%s629_s8 + $0x2] sm:$0x1] }
  0x23   : > { %v295_v39 = vstv %s473_s17  ;;  %v299_v42 = vstv %s474_s18 }
  0x24   : > { %260 = vst [vmem:[%s629_s8] sm:$0x1] %v259_v34  ;;  %v296_v41 = vmul.f32 %v295_v39, %v635_v8  ;;  %v275_v43 = vadd.f32 %v274_v32, %v271_v37  ;;  %v293_v44 = vadd.f32 %v292_v38, %v289_v35  ;;  %v300_v45 = vmul.f32 %v299_v42, %v638_v11 }
  0x25   : > { %v314_v46 = vstv %s479_s19  ;;  %v317_v49 = vstv %s480_s20 }
  0x26   : > { %v315_v48 = vmul.f32 %v314_v46, %v227_v5  ;;  %v279_v50 = vadd.f32 %v467_v40, %v275_v43  ;;  %v283_v51 = vmul.f32 %v275_v43, %v275_v43  ;;  %v297_v52 = vadd.f32 %v296_v41, %v293_v44  ;;  %v485_v5 = vld [vmem:[%s629_s8 + $0x3] sm:$0x1] }
  0x27   : > { %v318_v53 = vmul.f32 %v317_v49, %v632_v6  ;;  %v321_v55 = vstv %s653_s21  ;;  %v325_v56 = vstv %s482_s22 }
  0x28   : > { %468 = vst [vmem:[%s617_s28 + $0x1] sm:$0x1] %v279_v50  ;;  %v285_v57 = vadd.f32 %v469_v47, %v283_v51  ;;  %v301_v58 = vadd.f32 %v300_v45, %v297_v52  ;;  %v322_v60 = vmul.f32 %v321_v55, %v635_v8  ;;  %v326_v62 = vmul.f32 %v325_v56, %v638_v11 }
  0x29   : > { %v319_v59 = vadd.f32 %v318_v53, %v315_v48 }
  0x2a   : > { %470 = vst [vmem:[%s629_s8 + $0x1] sm:$0x1] %v285_v57  ;;  %v305_v63 = vadd.f32 %v475_v54, %v301_v58  ;;  %v309_v0 = vmul.f32 %v301_v58, %v301_v58 }
  0x2b   : > { %v323_v1 = vadd.f32 %v322_v60, %v319_v59 }
  0x2c   : > { %476 = vst [vmem:[%s617_s28 + $0x2] sm:$0x1] %v305_v63  ;;  %v311_v3 = vadd.f32 %v477_v61, %v309_v0 }
  0x2d   : > { %v327_v4 = vadd.f32 %v326_v62, %v323_v1 }
  0x2e   : > { %478 = vst [vmem:[%s629_s8 + $0x2] sm:$0x1] %v311_v3 }
  0x2f   : > { %v331_v6 = vadd.f32 %v483_v2, %v327_v4  ;;  %v335_v7 = vmul.f32 %v327_v4, %v327_v4 }
  0x31   : > { %484 = vst [vmem:[%s617_s28 + $0x3] sm:$0x1] %v331_v6  ;;  %v337_v9 = vadd.f32 %v485_v5, %v335_v7 }
  0x33   : > { %486 = vst [vmem:[%s629_s8 + $0x3] sm:$0x1] %v337_v9 }
  0x34 PF: > { %s15_s14 = sadd.s32 1, %s566_s14   ;;  %s689_s12 = smov %s562_s13 }
  0x35   : > { %p12_p8 = scmp.ge.s32.totalorder %s15_s14, 4   ;;  %s690_s13 = smov %s692_s16 }
  0x37   :  { %14 = sbr.rel (!%p12_p8) target bundleno = 2 (0x2), region = 88 }
  0x3c   :  { %372 = vsyncpa [#allocation3], 1 }
  0x3d   :  { %374 = vsyncpa [#allocation3 + $0x1], 1 }

</bundles_post_ra>
